<compile_context>
chip_gen: v6e
topology: v6e:2x2x1
jax: 0.10.0
libtpu: 0.0.40
codegen_flags: <defaults>
</compile_context>

<pallas_src>
import jax
import jax.numpy as jnp
import numpy as np
from jax import lax
from jax.experimental import pallas as pl
from jax.experimental.pallas import tpu as pltpu


def _round_up(x, m):
    return ((x + m - 1) // m) * m


def ncf_fused_kernel(idx_ref, a_u_ref, a_v_ref, b1_ref, w2_ref, out_ref):
    # idx_ref  : (2, TM)    int32  row 0 = user ids, row 1 = item ids (streamed)
    # a_u_ref  : (K, U_pad) f32    W1_u @ W_emb.T   (fused table, VMEM-resident)
    # a_v_ref  : (K, I_pad) f32    W1_v @ H_emb.T   (fused table, VMEM-resident)
    # b1_ref   : (K, 1)     f32
    # w2_ref   : (K, 1)     f32
    # out_ref  : (1, TM)    f32    lane-dense output slab
    tm = out_ref.shape[1]
    u_pad = a_u_ref.shape[1]
    i_pad = a_v_ref.shape[1]
    hi = lax.Precision.HIGHEST

    uidx = idx_ref[0:1, :]                                    # (1, TM)
    vidx = idx_ref[1:2, :]                                    # (1, TM)

    # Fused (embedding gather + linear_1) as one-hot matmuls against the
    # pre-folded tables. Tables are tiny and stay resident in VMEM.
    onehot_u = (lax.broadcasted_iota(jnp.int32, (u_pad, tm), 0) == uidx
                ).astype(jnp.float32)                         # (U_pad, TM)
    onehot_v = (lax.broadcasted_iota(jnp.int32, (i_pad, tm), 0) == vidx
                ).astype(jnp.float32)                         # (I_pad, TM)

    h1 = (jnp.dot(a_u_ref[...], onehot_u,
                  preferred_element_type=jnp.float32, precision=hi)
          + jnp.dot(a_v_ref[...], onehot_v,
                    preferred_element_type=jnp.float32, precision=hi)
          + b1_ref[...])                                      # (K, TM)
    h1 = jnp.maximum(h1, 0.0)

    # linear_2 (K -> 1, no bias): VPU multiply + sublane reduction.
    out_ref[...] = jnp.sum(h1 * w2_ref[...], axis=0, keepdims=True)   # (1, TM)


def prepare_snips_ncf_params(W_emb, H_emb, w1_t, b1, w2_t):
    """One-time (model-load) preprocessing; keep out of the per-call hot path."""
    K = W_emb.shape[1]
    hi = lax.Precision.HIGHEST

    u_pad = _round_up(W_emb.shape[0], 8)
    i_pad = _round_up(H_emb.shape[0], 8)
    wemb_t = jnp.pad(W_emb.T.astype(jnp.float32),
                     ((0, 0), (0, u_pad - W_emb.shape[0])))   # (K, U_pad)
    hemb_t = jnp.pad(H_emb.T.astype(jnp.float32),
                     ((0, 0), (0, i_pad - H_emb.shape[0])))   # (K, I_pad)

    # linear_1 halves in batch-on-lanes layout, folded into the tables:
    # h1_T = (W1_u @ W_emb.T) @ onehot_u + (W1_v @ H_emb.T) @ onehot_v + b1
    w1u = w1_t[:K, :].T.astype(jnp.float32)                   # (K, K)
    w1v = w1_t[K:, :].T.astype(jnp.float32)                   # (K, K)
    a_u = jnp.dot(w1u, wemb_t, precision=hi)                  # (K, U_pad)
    a_v = jnp.dot(w1v, hemb_t, precision=hi)                  # (K, I_pad)

    return {
        "a_u": a_u,
        "a_v": a_v,
        "b1": b1.reshape(K, 1).astype(jnp.float32),
        "w2": w2_t.reshape(K, 1).astype(jnp.float32),
    }


def _default_batch_tile(n):
    """grid=(1,) on single-TC v5e/v6e; two equal 'parallel' steps on 2-TC v7x."""
    try:
        kind = jax.devices()[0].device_kind.lower()
    except Exception:
        kind = ""
    num_tc = 2 if "v7" in kind else 1
    return _round_up(pl.cdiv(n, num_tc), 128)


def snips_ncf_forward(x_idx, params, *, tm=None):
    """SNIPS_NCF forward (is_training=False). x_idx: (N, 2) ints. Returns (N, 1) f32."""
    N = x_idx.shape[0]
    if tm is None:
        tm = _default_batch_tile(N)
    assert tm % 128 == 0, "batch tile must be a multiple of the 128-lane width"
    n_pad = _round_up(N, tm)

    # Single (2, n_pad) index stream; padded lanes use index 0 and are sliced off.
    idx_t = jnp.pad(x_idx.astype(jnp.int32).T, ((0, 0), (0, n_pad - N)))  # (2, n_pad)

    a_u, a_v, b1c, w2c = params["a_u"], params["a_v"], params["b1"], params["w2"]
    K, u_pad = a_u.shape
    i_pad = a_v.shape[1]

    grid = (n_pad // tm,)
    out_t = pl.pallas_call(
        ncf_fused_kernel,
        out_shape=jax.ShapeDtypeStruct((1, n_pad), jnp.float32),
        grid_spec=pltpu.PrefetchScalarGridSpec(
            num_scalar_prefetch=0,
            grid=grid,
            in_specs=[
                pl.BlockSpec((2, tm), lambda i: (0, i)),      # ids (streamed)
                pl.BlockSpec((K, u_pad), lambda i: (0, 0)),   # fused user table
                pl.BlockSpec((K, i_pad), lambda i: (0, 0)),   # fused item table
                pl.BlockSpec((K, 1), lambda i: (0, 0)),       # b1
                pl.BlockSpec((K, 1), lambda i: (0, 0)),       # W2
            ],
            out_specs=pl.BlockSpec((1, tm), lambda i: (0, i)),  # lane-dense output
        ),
        compiler_params=pltpu.CompilerParams(
            dimension_semantics=("parallel",)),
    )(idx_t, a_u, a_v, b1c, w2c)

    return out_t[0, :N].reshape(N, 1)


def reference_forward(x_idx, W_emb, H_emb, w1_t, b1, w2_t):
    u = jnp.take(W_emb, x_idx[:, 0], axis=0)
    v = jnp.take(H_emb, x_idx[:, 1], axis=0)
    z = jnp.concatenate([u, v], axis=1)
    h1 = jnp.maximum(jnp.dot(z, w1_t, precision=lax.Precision.HIGHEST) + b1, 0.0)
    return jnp.dot(h1, w2_t, precision=lax.Precision.HIGHEST)


if __name__ == "__main__":
    num_users = 10
    num_items = 12
    embedding_k = 4
    batch = 1024

    key = jax.random.PRNGKey(0)
    k_w, k_h, k_w1, k_b1, k_w2, k_u, k_i = jax.random.split(key, 7)

    # nn.Embedding default init: N(0, 1)
    W_emb = jax.random.normal(k_w, (num_users, embedding_k), dtype=jnp.float32)
    H_emb = jax.random.normal(k_h, (num_items, embedding_k), dtype=jnp.float32)

    # nn.Linear default init: U(-1/sqrt(fan_in), 1/sqrt(fan_in)); weights stored
    # pre-transposed as (in_features, out_features).
    fan1 = 2 * embedding_k
    bound1 = 1.0 / np.sqrt(fan1)
    w1_t = jax.random.uniform(k_w1, (2 * embedding_k, embedding_k),
                              minval=-bound1, maxval=bound1, dtype=jnp.float32)
    b1 = jax.random.uniform(k_b1, (embedding_k,),
                            minval=-bound1, maxval=bound1, dtype=jnp.float32)
    bound2 = 1.0 / np.sqrt(embedding_k)
    w2_t = jax.random.uniform(k_w2, (embedding_k, 1),
                              minval=-bound2, maxval=bound2, dtype=jnp.float32)

    # x: (N, 2) integer (user_idx, item_idx) pairs
    user_idx = jax.random.randint(k_u, (batch,), 0, num_users, dtype=jnp.int32)
    item_idx = jax.random.randint(k_i, (batch,), 0, num_items, dtype=jnp.int32)
    x_idx = jnp.stack([user_idx, item_idx], axis=1)

    # One-time preprocessing (model-load time), then the lean forward.
    params = jax.tree_util.tree_map(jax.block_until_ready,
                                    prepare_snips_ncf_params(W_emb, H_emb, w1_t, b1, w2_t))
    out = snips_ncf_forward(x_idx, params)
    out = jax.block_until_ready(out)

    ref = jax.block_until_ready(
        reference_forward(x_idx, W_emb, H_emb, w1_t, b1, w2_t))
    assert out.shape == (batch, 1)
    np.testing.assert_allclose(np.asarray(out), np.asarray(ref),
                               rtol=1e-4, atol=1e-4)

    print("KERNEL_OK")
</pallas_src>

<mosaic_0001>
module attributes {stable_mosaic.version = 11 : i64} {
  func.func @ncf_fused_kernel(%arg0: i32, %arg1: memref<2x1024xi32, #tpu.memory_space<vmem>>, %arg2: memref<4x16xf32, #tpu.memory_space<vmem>>, %arg3: memref<4x16xf32, #tpu.memory_space<vmem>>, %arg4: memref<4x1xf32, #tpu.memory_space<vmem>>, %arg5: memref<4x1xf32, #tpu.memory_space<vmem>>, %arg6: memref<1x1024xf32, #tpu.memory_space<vmem>>) attributes {dimension_semantics = [#tpu.dimension_semantics<parallel>], iteration_bounds = array<i64: 1>, scalar_prefetch = 0 : i64, scratch_operands = 0 : i64, tpu.core_type = #tpu.core_type<tc>, window_params = [{transform_indices = @transform_0, window_bounds = array<i64: 2, 1024>}, {pipeline_mode = #tpu.pipeline_mode<synchronous>, transform_indices = @transform_1, window_bounds = array<i64: 4, 16>}, {pipeline_mode = #tpu.pipeline_mode<synchronous>, transform_indices = @transform_2, window_bounds = array<i64: 4, 16>}, {pipeline_mode = #tpu.pipeline_mode<synchronous>, transform_indices = @transform_3, window_bounds = array<i64: 4, 1>}, {pipeline_mode = #tpu.pipeline_mode<synchronous>, transform_indices = @transform_4, window_bounds = array<i64: 4, 1>}, {transform_indices = @transform_5, window_bounds = array<i64: 1, 1024>}]} {
    %c0 = arith.constant 0 : index
    %c0_0 = arith.constant 0 : index
    %0 = vector.load %arg1[%c0, %c0_0] : memref<2x1024xi32, #tpu.memory_space<vmem>>, vector<1x1024xi32>
    %c1 = arith.constant 1 : index
    %c0_1 = arith.constant 0 : index
    %1 = vector.load %arg1[%c1, %c0_1] : memref<2x1024xi32, #tpu.memory_space<vmem>>, vector<1x1024xi32>
    %2 = tpu.iota {dimensions = array<i32: 0>} : vector<16x1024xi32>
    %3 = vector.broadcast %0 : vector<1x1024xi32> to vector<16x1024xi32>
    %4 = arith.cmpi eq, %2, %3 : vector<16x1024xi32>
    %5 = arith.extui %4 : vector<16x1024xi1> to vector<16x1024xi32>
    %6 = arith.sitofp %5 : vector<16x1024xi32> to vector<16x1024xf32>
    %7 = tpu.iota {dimensions = array<i32: 0>} : vector<16x1024xi32>
    %8 = vector.broadcast %1 : vector<1x1024xi32> to vector<16x1024xi32>
    %9 = arith.cmpi eq, %7, %8 : vector<16x1024xi32>
    %10 = arith.extui %9 : vector<16x1024xi1> to vector<16x1024xi32>
    %11 = arith.sitofp %10 : vector<16x1024xi32> to vector<16x1024xf32>
    %c0_2 = arith.constant 0 : index
    %c0_3 = arith.constant 0 : index
    %12 = vector.load %arg2[%c0_2, %c0_3] : memref<4x16xf32, #tpu.memory_space<vmem>>, vector<4x16xf32>
    %cst = arith.constant dense<0.000000e+00> : vector<4x1024xf32>
    %13 = tpu.matmul %12, %6, %cst {dimension_numbers = #tpu.dot_dimension_numbers<[1], [0], [0], [1], [0, 0, 1, 1], [], []>, precision = #tpu.contract_precision<fp32>} : vector<4x16xf32>, vector<16x1024xf32>, vector<4x1024xf32> -> vector<4x1024xf32>
    %c0_4 = arith.constant 0 : index
    %c0_5 = arith.constant 0 : index
    %14 = vector.load %arg3[%c0_4, %c0_5] : memref<4x16xf32, #tpu.memory_space<vmem>>, vector<4x16xf32>
    %cst_6 = arith.constant dense<0.000000e+00> : vector<4x1024xf32>
    %15 = tpu.matmul %14, %11, %cst_6 {dimension_numbers = #tpu.dot_dimension_numbers<[1], [0], [0], [1], [0, 0, 1, 1], [], []>, precision = #tpu.contract_precision<fp32>} : vector<4x16xf32>, vector<16x1024xf32>, vector<4x1024xf32> -> vector<4x1024xf32>
    %16 = arith.addf %13, %15 : vector<4x1024xf32>
    %c0_7 = arith.constant 0 : index
    %c0_8 = arith.constant 0 : index
    %17 = vector.load %arg4[%c0_7, %c0_8] : memref<4x1xf32, #tpu.memory_space<vmem>>, vector<4x1xf32>
    %18 = vector.broadcast %17 : vector<4x1xf32> to vector<4x1024xf32>
    %19 = arith.addf %16, %18 : vector<4x1024xf32>
    %cst_9 = arith.constant 0.000000e+00 : f32
    %20 = vector.broadcast %cst_9 : f32 to vector<4x1024xf32>
    %21 = arith.maximumf %19, %20 : vector<4x1024xf32>
    %c0_10 = arith.constant 0 : index
    %c0_11 = arith.constant 0 : index
    %22 = vector.load %arg5[%c0_10, %c0_11] : memref<4x1xf32, #tpu.memory_space<vmem>>, vector<4x1xf32>
    %23 = vector.broadcast %22 : vector<4x1xf32> to vector<4x1024xf32>
    %24 = arith.mulf %21, %23 : vector<4x1024xf32>
    %cst_12 = arith.constant dense<0.000000e+00> : vector<1024xf32>
    %25 = vector.multi_reduction <add>, %24, %cst_12 [0] : vector<4x1024xf32> to vector<1024xf32>
    %26 = vector.shape_cast %25 : vector<1024xf32> to vector<1x1024xf32>
    %c0_13 = arith.constant 0 : index
    %c0_14 = arith.constant 0 : index
    %27 = vector.load %arg6[%c0_13, %c0_14] : memref<1x1024xf32, #tpu.memory_space<vmem>>, vector<1x1024xf32>
    tpu.vector_store %arg6[%c0_13, %c0_14], %26 {strides = array<i32>} : memref<1x1024xf32, #tpu.memory_space<vmem>>, vector<1x1024xf32>,
    return
  }
  func.func @transform_0(%arg0: i32) -> (i32, i32) {
    %c0_i32 = arith.constant 0 : i32
    %c0_i32_0 = arith.constant 0 : i32
    return %c0_i32, %arg0 : i32, i32
  }
  func.func @transform_1(%arg0: i32) -> (i32, i32) {
    %c0_i32 = arith.constant 0 : i32
    %c0_i32_0 = arith.constant 0 : i32
    %c0_i32_1 = arith.constant 0 : i32
    return %c0_i32, %c0_i32_0 : i32, i32
  }
  func.func @transform_2(%arg0: i32) -> (i32, i32) {
    %c0_i32 = arith.constant 0 : i32
    %c0_i32_0 = arith.constant 0 : i32
    %c0_i32_1 = arith.constant 0 : i32
    return %c0_i32, %c0_i32_0 : i32, i32
  }
  func.func @transform_3(%arg0: i32) -> (i32, i32) {
    %c0_i32 = arith.constant 0 : i32
    %c0_i32_0 = arith.constant 0 : i32
    %c0_i32_1 = arith.constant 0 : i32
    return %c0_i32, %c0_i32_0 : i32, i32
  }
  func.func @transform_4(%arg0: i32) -> (i32, i32) {
    %c0_i32 = arith.constant 0 : i32
    %c0_i32_0 = arith.constant 0 : i32
    %c0_i32_1 = arith.constant 0 : i32
    return %c0_i32, %c0_i32_0 : i32, i32
  }
  func.func @transform_5(%arg0: i32) -> (i32, i32) {
    %c0_i32 = arith.constant 0 : i32
    %c0_i32_0 = arith.constant 0 : i32
    return %c0_i32, %arg0 : i32, i32
  }
}

</mosaic_0001>

<bundles_post_ra>
// kernel: tpu_custom_call.1
= control target key start
LH: loop header
LB: loop body
LE: loop exit
PB: predicated region body
PF: predicated region fallthrough
CT: control target
= control target key end

     0   :  { %10 = vsyncpa [#allocation3], 0  ;;  %s5586_s0 = inlined_call_operand.hbm [shape: s32[2,1024], index: 0, kind: input, shape index: {}]   ;;  %s5587_s1 = inlined_call_operand.vmem [shape: f32[4,16], index: 1, kind: input, shape index: {}]   ;;  %s5588_s2 = inlined_call_operand.vmem [shape: f32[4,16], index: 2, kind: input, shape index: {}]   ;;  %s5589_s3 = inlined_call_operand.vmem [shape: f32[4,1], index: 3, kind: input, shape index: {}]   ;;  %s5590_s4 = inlined_call_operand.vmem [shape: f32[4,1], index: 4, kind: input, shape index: {}]   ;;  %s5591_s5 = inlined_call_operand.hbm [shape: f32[1,1024], index: 5, kind: output, shape index: {}]  }
   0x1   :  { %11 = vsyncpa [#allocation4], 0  ;;  %s4482_s18 = smov [#allocation2]  }
   0x2   :  { %s18_s19 = sshll.u32 %s4482_s18, 4  ;;  %s19_s19 = int_to_ptr.vmem [resolvable:$true] %s18_s19 }
   0x3   :  { %s4446_s20 = scalar_lea.vmem %s19_s19, 256  ;;  %p4451_p1 = scmp.lt.s32.totalorder %s19_s19, %s19_s19 }
   0x4   :  { %p4447_p0 = scmp.ne.s32.totalorder %s19_s19, %s4446_s20  ;;  %p4452_p2 = scmp.lt.s32.totalorder %s4446_s20, %s4446_s20 }
   0x6   :  { %p4453_p3 = por %p4452_p2, %p4451_p1 }
   0x8   :  { %p4454_p4 = pnand %p4453_p3, %p4447_p0 }
   0xa   :  { %4457 = shalt.err (!%p4454_p4)
}
   0xb   :  { %21 = dma.hbm_to_vmem [thread:$0]  %s5586_s0, 256, %s19_s19, [#allocation3]  }
   0xc   :  { %4478 = dma.done.wait [#allocation3], 256  }
   0xd   :  { %4479 = vsyncadd [#allocation3], 4294967040  ;;  %v36_v0 = vlaneseq  ;;  %v4483_v1 = vmov 0.0   ;;  %vm201_vm0 = vcmask 130048   ;;  %v4532_v8 = vld [vmem:[#allocation2 + $0x1] ss:$2 sm:$0xff] }
   0xe   :  { %273 = vmatprep.mubr.f32.mxu0 %v4483_v1  ;;  %369 = vmatprep.mubr.f32.mxu1 %v4483_v1  ;;  %v200_v9 = vld [vmem:[%s5588_s2] sm:$0xf]  ;;  %v4484_v16 = vmov 1.0  }
   0xf   :  { %v4523_v2 = vshrl.u32 %v36_v0, 7  ;;  %v203_v12 = vsel %vm201_vm0, %v200_v9, 0  ;;  %v4652_v51 = vld [vmem:[#allocation2] ss:$2 sm:$0xff] }
  0x10   :  { %v4548_v13 = vand.u32 4294901760, %v203_v12 }
  0x11   :  { %v45_v3 = vsub.s32 1, %v4523_v2  ;;  %v41_v4 = vsub.s32 0, %v4523_v2  ;;  %v53_v5 = vsub.s32 3, %v4523_v2  ;;  %v49_v6 = vsub.s32 2, %v4523_v2 }
  0x12   :  { %v4530_v7 = vadd.s32 8, %v4523_v2  ;;  %v4581_v19 = vsub.f32 %v203_v12, %v4548_v13  ;;  %v61_v50 = vsub.s32 5, %v4523_v2  ;;  %v57_v53 = vsub.s32 4, %v4523_v2 }
  0x13   :  { %v4540_v10 = vrot.slane %v4532_v8, %v45_v3  ;;  %v4545_v11 = vrot.slane %v4532_v8, %v41_v4  ;;  %v4553_v14 = vrot.slane %v4532_v8, %v53_v5  ;;  %v4558_v15 = vrot.slane %v4532_v8, %v49_v6 }
  0x14   :  { %v4600_v25 = vand.u32 4294901760, %v4581_v19  ;;  %v4669_v55 = vrot.slane %v4652_v51, %v45_v3  ;;  %v4683_v58 = vrot.slane %v4532_v8, %v61_v50  ;;  %v4696_v60 = vrot.slane %v4532_v8, %v57_v53 }
  0x15   :  { %vm160_vm1 = vcmp.eq.s32.totalorder %v4530_v7, %v4540_v10  ;;  %vm159_vm2 = vcmp.eq.s32.totalorder %v4530_v7, %v4545_v11  ;;  %vm152_vm3 = vcmp.eq.s32.totalorder %v4523_v2, %v4540_v10  ;;  %vm151_vm4 = vcmp.eq.s32.totalorder %v4523_v2, %v4545_v11 }
  0x16   :  { %4335 = vmatprep.subr.msk.mxu0 %vm160_vm1, %v4484_v16  ;;  %v4327_v17 = vsel %vm159_vm2, 1.0, %v4483_v1  ;;  %v4319_v18 = vsel %vm151_vm4, 1.0, %v4483_v1  ;;  %v4328_v20 = vsel %vm160_vm1, 1.0, %v4483_v1  ;;  %v4320_v23 = vsel %vm152_vm3, 1.0, %v4483_v1 }
  0x17   :  { %4336 = vmatpush1.msk.msra.mxu0 %vm159_vm2, %v4484_v16  ;;  %v314_v21 = vsub.f32 %v4328_v20, %v4328_v20  ;;  %v320_v22 = vsub.f32 %v4327_v17, %v4327_v17  ;;  %v332_v24 = vsub.f32 %v4319_v18, %v4319_v18  ;;  %v326_v26 = vsub.f32 %v4320_v23, %v4320_v23 }
  0x18   :  { %4337 = vmatprep.subr.msk.mxu0 %vm152_vm3, %v4484_v16  ;;  %v277_v30 = vsub.f32 %v4581_v19, %v4600_v25  ;;  %vm162_vm5 = vcmp.eq.s32.totalorder %v4530_v7, %v4553_v14  ;;  %vm161_vm6 = vcmp.eq.s32.totalorder %v4530_v7, %v4558_v15  ;;  %vm154_vm7 = vcmp.eq.s32.totalorder %v4523_v2, %v4553_v14 }
  0x19   :  { %4338 = vmatpush1.msk.msra.mxu0 %vm151_vm4, %v4484_v16  ;;  %v315_v27 = vand.u32 4294901760, %v314_v21  ;;  %v321_v28 = vand.u32 4294901760, %v320_v22  ;;  %v333_v29 = vand.u32 4294901760, %v332_v24  ;;  %v327_v31 = vand.u32 4294901760, %v326_v26 }
  0x1a   :  { %407 = vmatprep.subr.mxu0 %v314_v21  ;;  %v4612_v35 = vand.u32 4294901760, %v277_v30  ;;  %v4330_v39 = vsel %vm162_vm5, 1.0, %v4483_v1  ;;  %vm153_vm8 = vcmp.eq.s32.totalorder %v4523_v2, %v4558_v15  ;;  %v4329_v42 = vsel %vm161_vm6, 1.0, %v4483_v1 }
  0x1b   :  { %v316_v32 = vsub.f32 %v314_v21, %v315_v27  ;;  %v322_v33 = vsub.f32 %v320_v22, %v321_v28  ;;  %v334_v34 = vsub.f32 %v332_v24, %v333_v29  ;;  %v328_v36 = vsub.f32 %v326_v26, %v327_v31 }
  0x1c   :  { %279 = vmatmul.mubr.f32.vlgmr.msra.gmra.mxu0 %v4612_v35  ;;  %v4322_v43 = vsel %vm154_vm7, 1.0, %v4483_v1  ;;  %v4631_v44 = vsub.f32 %v4330_v39, %v4330_v39  ;;  %v4633_v45 = vsub.f32 %v4329_v42, %v4329_v42  ;;  %v4321_v46 = vsel %vm153_vm8, 1.0, %v4483_v1 }
  0x1d   :  { %v317_v37 = vand.u32 4294901760, %v316_v32  ;;  %v323_v38 = vand.u32 4294901760, %v322_v33  ;;  %v329_v40 = vand.u32 4294901760, %v328_v36  ;;  %v335_v41 = vand.u32 4294901760, %v334_v34  ;;  %410 = vmatpush1.msra.mxu0 %v320_v22  ;;  %449 = vmatprep.mubr.f32.mxu0 %v4483_v1 }
  0x1e   :  { %413 = vmatprep.subr.mxu0 %v326_v26  ;;  %v4640_v47 = vsub.f32 %v4322_v43, %v4322_v43  ;;  %v806_v48 = vand.u32 4294901760, %v4631_v44  ;;  %v4649_v49 = vsub.f32 %v4321_v46, %v4321_v46  ;;  %v812_v52 = vand.u32 4294901760, %v4633_v45 }
  0x1f   :  { %318 = vmatprep.subr.mxu1 %v317_v37  ;;  %416 = vmatpush1.msra.mxu0 %v332_v24  ;;  %vm80_vm9 = vcmp.eq.s32.totalorder %v4530_v7, %v4669_v55  ;;  %vm164_vm10 = vcmp.eq.s32.totalorder %v4530_v7, %v4683_v58  ;;  %v4732_v0 = vrot.slane %v4652_v51, %v41_v4  ;;  %v69_v24 = vsub.s32 7, %v4523_v2 }
  0x20   :  { %324 = vmatpush1.msra.mxu1 %v323_v38  ;;  %452 = vmatmul.mubr.f32.vlgmr.msra.gmra.mxu0 %v4581_v19  ;;  %v818_v54 = vand.u32 4294901760, %v4640_v47  ;;  %v807_v56 = vsub.f32 %v4631_v44, %v806_v48  ;;  %v824_v57 = vand.u32 4294901760, %v4649_v49  ;;  %v813_v59 = vsub.f32 %v4633_v45, %v812_v52 }
  0x21   :  { %330 = vmatprep.subr.mxu1 %v329_v40  ;;  %567 = vmatprep.subr.mxu0 %v315_v27  ;;  %vm163_vm11 = vcmp.eq.s32.totalorder %v4530_v7, %v4696_v60  ;;  %vm156_vm12 = vcmp.eq.s32.totalorder %v4523_v2, %v4683_v58  ;;  %vm79_vm13 = vcmp.eq.s32.totalorder %v4530_v7, %v4732_v0  ;;  %v4332_v9 = vsel %vm164_vm10, 1.0, %v4483_v1 }
  0x22   :  { %336 = vmatpush1.msra.mxu1 %v335_v41  ;;  %571 = vmatpush1.msra.mxu0 %v321_v28  ;;  %v819_v61 = vsub.f32 %v4640_v47, %v818_v54  ;;  %v808_v62 = vand.u32 4294901760, %v807_v56  ;;  %v825_v63 = vsub.f32 %v4649_v49, %v824_v57  ;;  %v814_v3 = vand.u32 4294901760, %v813_v59 }
  0x23   :  { %371 = vmatmul.mubr.f32.vlgmr.msra.gmra.mxu1 %v4548_v13  ;;  %4339 = vmatprep.subr.msk.mxu1 %vm160_vm1, %v4484_v16  ;;  %vm155_vm14 = vcmp.eq.s32.totalorder %v4523_v2, %v4696_v60  ;;  %v4331_v11 = vsel %vm163_vm11, 1.0, %v4483_v1  ;;  %v4324_v12 = vsel %vm156_vm12, 1.0, %v4483_v1  ;;  %v4769_v17 = vsub.f32 %v4332_v9, %v4332_v9 }
  0x24   :  { %4340 = vmatpush1.msk.msra.mxu1 %vm159_vm2, %v4484_v16  ;;  %575 = vmatprep.subr.mxu0 %v327_v31  ;;  %v820_v4 = vand.u32 4294901760, %v819_v61  ;;  %v826_v10 = vand.u32 4294901760, %v825_v63  ;;  %v4773_v18 = vsub.f32 %v4331_v11, %v4331_v11  ;;  %v4323_v20 = vsel %vm155_vm14, 1.0, %v4483_v1 }
  0x25   :  { %4341 = vmatprep.subr.msk.mxu1 %vm152_vm3, %v4484_v16  ;;  %579 = vmatpush1.msra.mxu0 %v333_v29  ;;  %v4782_v21 = vrot.slane %v4652_v51, %v53_v5  ;;  %v4785_v22 = vsub.f32 %v4324_v12, %v4324_v12  ;;  %v4790_v23 = vrot.slane %v4652_v51, %v49_v6  ;;  %v1297_v5 = vand.u32 4294901760, %v4769_v17 }
  0x26   :  { %612 = vmatprep.mubr.f32.mxu0 %v4483_v1  ;;  %4342 = vmatpush1.msk.msra.mxu1 %vm151_vm4, %v4484_v16  ;;  %v4804_v6 = vsub.f32 %v4323_v20, %v4323_v20  ;;  %v4811_v26 = vrot.slane %v4652_v51, %v61_v50  ;;  %v1303_v27 = vand.u32 4294901760, %v4773_v18  ;;  %v65_v28 = vsub.s32 6, %v4523_v2 }
  0x27   :  { %526 = vmatprep.mubr.f32.mxu1 %v4483_v1  ;;  %614 = vmatmul.mubr.f32.vlgmr.msra.gmra.mxu0 %v4548_v13  ;;  %vm82_vm15 = vcmp.eq.s32.totalorder %v4530_v7, %v4782_v21  ;;  %v1309_v29 = vand.u32 4294901760, %v4785_v22  ;;  %v4832_v30 = vrot.slane %v4532_v8, %v69_v24  ;;  %v1298_v31 = vsub.f32 %v4769_v17, %v1297_v5 }
  0x28   :  { %4347 = vmatprep.subr.msk.mxu0 %vm162_vm5, %v4484_v16  ;;  %530 = vmatmul.mubr.f32.vlgmr.msra.gmra.mxu1 %v4600_v25  ;;  %v1315_v32 = vand.u32 4294901760, %v4804_v6  ;;  %v4848_v33 = vrot.slane %v4652_v51, %v57_v53  ;;  %v1304_v34 = vsub.f32 %v4773_v18, %v1303_v27  ;;  %v4859_v36 = vrot.slane %v4532_v8, %v65_v28  ;;  %v199_v53 = vld [vmem:[%s5587_s1] sm:$0xf] }
  0x29   :  { %4343 = vmatprep.subr.msk.mxu1 %vm160_vm1, %v4484_v16  ;;  %4348 = vmatpush1.msk.msra.mxu0 %vm161_vm6, %v4484_v16  ;;  %vm81_vm1 = vcmp.eq.s32.totalorder %v4530_v7, %v4790_v23  ;;  %v1310_v37 = vsub.f32 %v4785_v22, %v1309_v29  ;;  %v1299_v8 = vand.u32 4294901760, %v1298_v31  ;;  %v4905_v40 = vrot.slane %v4652_v51, %v69_v24 }
  0x2a   :  { %4344 = vmatpush1.msk.msra.mxu1 %vm159_vm2, %v4484_v16  ;;  %4349 = vmatprep.subr.msk.mxu0 %vm154_vm7, %v4484_v16  ;;  %vm84_vm2 = vcmp.eq.s32.totalorder %v4530_v7, %v4811_v26  ;;  %v1316_v38 = vsub.f32 %v4804_v6, %v1315_v32  ;;  %v1305_v39 = vand.u32 4294901760, %v1304_v34  ;;  %v4914_v15 = vrot.slane %v4652_v51, %v65_v28 }
  0x2b   :  { %4345 = vmatprep.subr.msk.mxu1 %vm152_vm3, %v4484_v16  ;;  %4350 = vmatpush1.msk.msra.mxu0 %vm153_vm8, %v4484_v16  ;;  %v1311_v14 = vand.u32 4294901760, %v1310_v37  ;;  %v2170_v61 = vsel %vm201_vm0, %v199_v53, 0  ;;  %vm72_vm0 = vcmp.eq.s32.totalorder %v4523_v2, %v4669_v55  ;;  %v4312_v9 = vsel %vm80_vm9, 1.0, %v4483_v1 }
  0x2c   :  { %764 = vmatprep.mubr.f32.mxu0 %v4483_v1  ;;  %4346 = vmatpush1.msk.msra.mxu1 %vm151_vm4, %v4484_v16  ;;  %vm166_vm4 = vcmp.eq.s32.totalorder %v4530_v7, %v4832_v30  ;;  %v1317_v42 = vand.u32 4294901760, %v1316_v38  ;;  %vm85_vm3 = vcmp.eq.s32.totalorder %v4530_v7, %v4914_v15  ;;  %v4304_v11 = vsel %vm72_vm0, 1.0, %v4483_v1 }
  0x2d   :  { %688 = vmatprep.mubr.f32.mxu1 %v4483_v1  ;;  %770 = vmatmul.mubr.f32.vlgmr.msra.gmra.mxu0 %v4612_v35  ;;  %v4334_v41 = vsel %vm166_vm4, 1.0, %v4483_v1  ;;  %v5048_v12 = vsub.f32 %v4312_v9, %v4312_v9  ;;  %v5059_v20 = vsub.f32 %v4304_v11, %v4304_v11  ;;  %v4314_v38 = vsel %vm82_vm15, 1.0, %v4483_v1 }
  0x2e   :  { %898 = vmatprep.subr.mxu0 %v4631_v44  ;;  %690 = vmatmul.mubr.f32.vlgmr.msra.gmra.mxu1 %v4548_v13 }
  0x2f   :  { %809 = vmatprep.subr.mxu1 %v808_v62  ;;  %901 = vmatpush1.msra.mxu0 %v4633_v45  ;;  %v4931_v45 = vsub.f32 %v4334_v41, %v4334_v41  ;;  %v2282_v24 = vand.u32 4294901760, %v5048_v12 }
  0x30   :  { %815 = vmatpush1.msra.mxu1 %v814_v3  ;;  %904 = vmatprep.subr.mxu0 %v4640_v47 }
  0x31   :  { %821 = vmatprep.subr.mxu1 %v820_v4  ;;  %907 = vmatpush1.msra.mxu0 %v4649_v49  ;;  %v1788_v49 = vand.u32 4294901760, %v4931_v45  ;;  %v5017_v4 = vand.u32 4294901760, %v2170_v61  ;;  %v2283_v28 = vsub.f32 %v5048_v12, %v2282_v24 }
  0x32   :  { %940 = vmatprep.mubr.f32.mxu0 %v4483_v1  ;;  %827 = vmatpush1.msra.mxu1 %v826_v10  ;;  %v4311_v10 = vsel %vm79_vm13, 1.0, %v4483_v1 }
  0x33   :  { %860 = vmatprep.mubr.f32.mxu1 %v4483_v1  ;;  %943 = vmatmul.mubr.f32.vlgmr.msra.gmra.mxu0 %v4581_v19 }
  0x34   :  { %1058 = vmatprep.subr.mxu0 %v806_v48  ;;  %862 = vmatmul.mubr.f32.vlgmr.msra.gmra.mxu1 %v4548_v13 }
  0x35   :  { %4351 = vmatprep.subr.msk.mxu1 %vm162_vm5, %v4484_v16  ;;  %1062 = vmatpush1.msra.mxu0 %v812_v52 }
  0x36   :  { %4352 = vmatpush1.msk.msra.mxu1 %vm161_vm6, %v4484_v16  ;;  %1066 = vmatprep.subr.mxu0 %v818_v54  ;;  %v1789_v54 = vsub.f32 %v4931_v45, %v1788_v49 }
  0x37   :  { %4353 = vmatprep.subr.msk.mxu1 %vm154_vm7, %v4484_v16  ;;  %1070 = vmatpush1.msra.mxu0 %v824_v57 }
  0x38   :  { %1103 = vmatprep.mubr.f32.mxu0 %v4483_v1  ;;  %4354 = vmatpush1.msk.msra.mxu1 %vm153_vm8, %v4484_v16  ;;  %v1790_v62 = vand.u32 4294901760, %v1789_v54 }
  0x39   :  { %1017 = vmatprep.mubr.f32.mxu1 %v4483_v1  ;;  %1105 = vmatmul.mubr.f32.vlgmr.msra.gmra.mxu0 %v4548_v13 }
  0x3a   :  { %4359 = vmatprep.subr.msk.mxu0 %vm164_vm10, %v4484_v16  ;;  %1021 = vmatmul.mubr.f32.vlgmr.msra.gmra.mxu1 %v4600_v25 }
  0x3b   :  { %4355 = vmatprep.subr.msk.mxu1 %vm162_vm5, %v4484_v16  ;;  %4360 = vmatpush1.msk.msra.mxu0 %vm163_vm11, %v4484_v16  ;;  %vm165_vm5 = vcmp.eq.s32.totalorder %v4530_v7, %v4859_v36 }
  0x3c   :  { %4356 = vmatpush1.msk.msra.mxu1 %vm161_vm6, %v4484_v16  ;;  %4361 = vmatprep.subr.msk.mxu0 %vm156_vm12, %v4484_v16  ;;  %vm158_vm6 = vcmp.eq.s32.totalorder %v4523_v2, %v4832_v30  ;;  %v4333_v43 = vsel %vm165_vm5, 1.0, %v4483_v1 }
  0x3d   :  { %4357 = vmatprep.subr.msk.mxu1 %vm154_vm7, %v4484_v16  ;;  %4362 = vmatpush1.msk.msra.mxu0 %vm155_vm14, %v4484_v16  ;;  %vm157_vm7 = vcmp.eq.s32.totalorder %v4523_v2, %v4859_v36  ;;  %v4326_v44 = vsel %vm158_vm6, 1.0, %v4483_v1  ;;  %v4937_v46 = vsub.f32 %v4333_v43, %v4333_v43 }
  0x3e   :  { %1255 = vmatprep.mubr.f32.mxu0 %v4483_v1  ;;  %4358 = vmatpush1.msk.msra.mxu1 %vm153_vm8, %v4484_v16  ;;  %vm86_vm8 = vcmp.eq.s32.totalorder %v4530_v7, %v4905_v40  ;;  %v4325_v47 = vsel %vm157_vm7, 1.0, %v4483_v1  ;;  %v4944_v48 = vsub.f32 %v4326_v44, %v4326_v44 }
  0x3f   :  { %1179 = vmatprep.mubr.f32.mxu1 %v4483_v1  ;;  %1261 = vmatmul.mubr.f32.vlgmr.msra.gmra.mxu0 %v4612_v35  ;;  %v4955_v50 = vsub.f32 %v4325_v47, %v4325_v47  ;;  %v1794_v51 = vand.u32 4294901760, %v4937_v46 }
  0x40   :  { %1389 = vmatprep.subr.mxu0 %v4769_v17  ;;  %1181 = vmatmul.mubr.f32.vlgmr.msra.gmra.mxu1 %v4548_v13  ;;  %v1800_v52 = vand.u32 4294901760, %v4944_v48  ;;  %v5052_v17 = vsub.f32 %v4311_v10, %v4311_v10 }
  0x41   :  { %1300 = vmatprep.subr.mxu1 %v1299_v8  ;;  %1392 = vmatpush1.msra.mxu0 %v4773_v18  ;;  %v1806_v56 = vand.u32 4294901760, %v4955_v50  ;;  %v1795_v57 = vsub.f32 %v4937_v46, %v1794_v51 }
  0x42   :  { %1306 = vmatpush1.msra.mxu1 %v1305_v39  ;;  %1395 = vmatprep.subr.mxu0 %v4785_v22  ;;  %v1801_v59 = vsub.f32 %v4944_v48, %v1800_v52  ;;  %v4313_v39 = vsel %vm81_vm1, 1.0, %v4483_v1 }
  0x43   :  { %1312 = vmatprep.subr.mxu1 %v1311_v14  ;;  %1398 = vmatpush1.msra.mxu0 %v4804_v6  ;;  %v1807_v63 = vsub.f32 %v4955_v50, %v1806_v56  ;;  %v1796_v3 = vand.u32 4294901760, %v1795_v57  ;;  %v2294_v6 = vand.u32 4294901760, %v5059_v20  ;;  %v5159_v41 = vsub.f32 %v4313_v39, %v4313_v39 }
  0x44   :  { %1431 = vmatprep.mubr.f32.mxu0 %v4483_v1  ;;  %1318 = vmatpush1.msra.mxu1 %v1317_v42  ;;  %v1802_v58 = vand.u32 4294901760, %v1801_v59 }
  0x45   :  { %1351 = vmatprep.mubr.f32.mxu1 %v4483_v1  ;;  %1434 = vmatmul.mubr.f32.vlgmr.msra.gmra.mxu0 %v4581_v19  ;;  %v1808_v60 = vand.u32 4294901760, %v1807_v63 }
  0x46   :  { %1549 = vmatprep.subr.mxu0 %v1297_v5  ;;  %1353 = vmatmul.mubr.f32.vlgmr.msra.gmra.mxu1 %v4548_v13 }
  0x47   :  { %4363 = vmatprep.subr.msk.mxu1 %vm164_vm10, %v4484_v16  ;;  %1553 = vmatpush1.msra.mxu0 %v1303_v27 }
  0x48   :  { %4364 = vmatpush1.msk.msra.mxu1 %vm163_vm11, %v4484_v16  ;;  %1557 = vmatprep.subr.mxu0 %v1309_v29 }
  0x49   :  { %4365 = vmatprep.subr.msk.mxu1 %vm156_vm12, %v4484_v16  ;;  %1561 = vmatpush1.msra.mxu0 %v1315_v32  ;;  %v2295_v32 = vsub.f32 %v5059_v20, %v2294_v6 }
  0x4a   :  { %1594 = vmatprep.mubr.f32.mxu0 %v4483_v1  ;;  %4366 = vmatpush1.msk.msra.mxu1 %vm155_vm14, %v4484_v16 }
  0x4b   :  { %1508 = vmatprep.mubr.f32.mxu1 %v4483_v1  ;;  %1596 = vmatmul.mubr.f32.vlgmr.msra.gmra.mxu0 %v4548_v13  ;;  %v2296_v30 = vand.u32 4294901760, %v2295_v32 }
  0x4c   :  { %4371 = vmatprep.subr.msk.mxu0 %vm166_vm4, %v4484_v16  ;;  %1512 = vmatmul.mubr.f32.vlgmr.msra.gmra.mxu1 %v4600_v25 }
  0x4d   :  { %4367 = vmatprep.subr.msk.mxu1 %vm164_vm10, %v4484_v16  ;;  %4372 = vmatpush1.msk.msra.mxu0 %vm165_vm5, %v4484_v16  ;;  %vm71_vm10 = vcmp.eq.s32.totalorder %v4523_v2, %v4732_v0 }
  0x4e   :  { %4368 = vmatpush1.msk.msra.mxu1 %vm163_vm11, %v4484_v16  ;;  %4373 = vmatprep.subr.msk.mxu0 %vm158_vm6, %v4484_v16  ;;  %v4303_v18 = vsel %vm71_vm10, 1.0, %v4483_v1  ;;  %vm74_vm11 = vcmp.eq.s32.totalorder %v4523_v2, %v4782_v21 }
  0x4f   :  { %4369 = vmatprep.subr.msk.mxu1 %vm156_vm12, %v4484_v16  ;;  %4374 = vmatpush1.msk.msra.mxu0 %vm157_vm7, %v4484_v16  ;;  %v5071_v5 = vsub.f32 %v4303_v18, %v4303_v18  ;;  %vm73_vm12 = vcmp.eq.s32.totalorder %v4523_v2, %v4790_v23  ;;  %v4306_v14 = vsel %vm74_vm11, 1.0, %v4483_v1 }
  0x50   :  { %1746 = vmatprep.mubr.f32.mxu0 %v4483_v1  ;;  %4370 = vmatpush1.msk.msra.mxu1 %vm155_vm14, %v4484_v16  ;;  %v4305_v42 = vsel %vm73_vm12, 1.0, %v4483_v1  ;;  %v5166_v43 = vsub.f32 %v4306_v14, %v4306_v14  ;;  %vm5592_vm14 = vcmp.eq.s32.totalorder %v4530_v7, %v4848_v33  ;;  %v4158_v7 = vld [vmem:[%s5590_s4] sm:$0xf] }
  0x51   :  { %1670 = vmatprep.mubr.f32.mxu1 %v4483_v1  ;;  %1752 = vmatmul.mubr.f32.vlgmr.msra.gmra.mxu0 %v4612_v35  ;;  %v5041_v35 = vsub.f32 %v2170_v61, %v5017_v4  ;;  %v2300_v29 = vand.u32 4294901760, %v5071_v5  ;;  %v4315_v57 = vsel %vm5592_vm14, 1.0, %v4483_v1 }
  0x52   :  { %1880 = vmatprep.subr.mxu0 %v4931_v45  ;;  %1672 = vmatmul.mubr.f32.vlgmr.msra.gmra.mxu1 %v4548_v13  ;;  %v5175_v45 = vsub.f32 %v4305_v42, %v4305_v42  ;;  %v2785_v47 = vand.u32 4294901760, %v5166_v43 }
  0x53   :  { %1791 = vmatprep.subr.mxu1 %v1790_v62  ;;  %1883 = vmatpush1.msra.mxu0 %v4937_v46  ;;  %v5063_v22 = vand.u32 4294901760, %v5041_v35  ;;  %v2301_v37 = vsub.f32 %v5071_v5, %v2300_v29  ;;  %v2779_v46 = vand.u32 4294901760, %v5159_v41  ;;  %v5259_v62 = vsub.f32 %v4315_v57, %v4315_v57 }
  0x54   :  { %1797 = vmatpush1.msra.mxu1 %v1796_v3  ;;  %1886 = vmatprep.subr.mxu0 %v4944_v48 }
  0x55   :  { %1803 = vmatprep.subr.mxu1 %v1802_v58  ;;  %1889 = vmatpush1.msra.mxu0 %v4955_v50  ;;  %v2244_v27 = vsub.f32 %v5041_v35, %v5063_v22  ;;  %v2302_v36 = vand.u32 4294901760, %v2301_v37  ;;  %v2780_v50 = vsub.f32 %v5159_v41, %v2779_v46 }
  0x56   :  { %1922 = vmatprep.mubr.f32.mxu0 %v4483_v1  ;;  %1809 = vmatpush1.msra.mxu1 %v1808_v60  ;;  %v3270_v60 = vand.u32 4294901760, %v5259_v62 }
  0x57   :  { %1842 = vmatprep.mubr.f32.mxu1 %v4483_v1  ;;  %1925 = vmatmul.mubr.f32.vlgmr.msra.gmra.mxu0 %v4581_v19  ;;  %v2288_v19 = vand.u32 4294901760, %v5052_v17  ;;  %v5113_v34 = vand.u32 4294901760, %v2244_v27  ;;  %v2781_v54 = vand.u32 4294901760, %v2780_v50 }
  0x58   :  { %2040 = vmatprep.subr.mxu0 %v1788_v49  ;;  %1844 = vmatmul.mubr.f32.vlgmr.msra.gmra.mxu1 %v4548_v13  ;;  %v2791_v49 = vand.u32 4294901760, %v5175_v45 }
  0x59   :  { %4375 = vmatprep.subr.msk.mxu1 %vm166_vm4, %v4484_v16  ;;  %2044 = vmatpush1.msra.mxu0 %v1794_v51  ;;  %v2289_v31 = vsub.f32 %v5052_v17, %v2288_v19  ;;  %v2786_v51 = vsub.f32 %v5166_v43, %v2785_v47 }
  0x5a   :  { %4376 = vmatpush1.msk.msra.mxu1 %vm165_vm5, %v4484_v16  ;;  %2048 = vmatprep.subr.mxu0 %v1800_v52  ;;  %v2792_v53 = vsub.f32 %v5175_v45, %v2791_v49 }
  0x5b   :  { %4377 = vmatprep.subr.msk.mxu1 %vm158_vm6, %v4484_v16  ;;  %2052 = vmatpush1.msra.mxu0 %v1806_v56  ;;  %v2290_v8 = vand.u32 4294901760, %v2289_v31  ;;  %v2787_v55 = vand.u32 4294901760, %v2786_v51  ;;  %v4316_v56 = vsel %vm84_vm2, 1.0, %v4483_v1 }
  0x5c   :  { %2085 = vmatprep.mubr.f32.mxu0 %v4483_v1  ;;  %4378 = vmatpush1.msk.msra.mxu1 %vm157_vm7, %v4484_v16  ;;  %v2793_v0 = vand.u32 4294901760, %v2792_v53  ;;  %v5255_v61 = vsub.f32 %v4316_v56, %v4316_v56 }
  0x5d   :  { %1999 = vmatprep.mubr.f32.mxu1 %v4483_v1  ;;  %2087 = vmatmul.mubr.f32.vlgmr.msra.gmra.mxu0 %v4548_v13 }
  0x5e   :  { %4383 = vmatprep.subr.msk.mxu0 %vm80_vm9, %v4484_v16  ;;  %2003 = vmatmul.mubr.f32.vlgmr.msra.gmra.mxu1 %v4600_v25  ;;  %v2284_v25 = vand.u32 4294901760, %v2283_v28  ;;  %v3264_v58 = vand.u32 4294901760, %v5255_v61 }
  0x5f   :  { %4379 = vmatprep.subr.msk.mxu1 %vm166_vm4, %v4484_v16  ;;  %4384 = vmatpush1.msk.msra.mxu0 %vm79_vm13, %v4484_v16  ;;  %vm5593_vm4 = vmmov %vm5592_vm14 }
  0x60   :  { %4380 = vmatpush1.msk.msra.mxu1 %vm165_vm5, %v4484_v16  ;;  %4385 = vmatprep.subr.msk.mxu0 %vm72_vm0, %v4484_v16  ;;  %v3265_v11 = vsub.f32 %v5255_v61, %v3264_v58  ;;  %vm5594_vm5 = vmmov %vm5593_vm4 }
  0x61   :  { %4381 = vmatprep.subr.msk.mxu1 %vm158_vm6, %v4484_v16  ;;  %4386 = vmatpush1.msk.msra.mxu0 %vm71_vm10, %v4484_v16  ;;  %vm5595_vm6 = vmmov %vm5593_vm4 }
  0x62   :  { %2240 = vmatprep.mubr.f32.mxu0 %v4483_v1  ;;  %4382 = vmatpush1.msk.msra.mxu1 %vm157_vm7, %v4484_v16 }
  0x63   :  { %2161 = vmatprep.mubr.f32.mxu1 %v4483_v1  ;;  %2246 = vmatmul.mubr.f32.vlgmr.msra.gmra.mxu0 %v5113_v34 }
  0x64   :  { %2374 = vmatprep.subr.mxu0 %v5048_v12  ;;  %2163 = vmatmul.mubr.f32.vlgmr.msra.gmra.mxu1 %v4548_v13  ;;  %v5155_v13 = vsub.f32 %v4314_v38, %v4314_v38 }
  0x65   :  { %2285 = vmatprep.subr.mxu1 %v2284_v25  ;;  %2377 = vmatpush1.msra.mxu0 %v5052_v17  ;;  %v3271_v17 = vsub.f32 %v5259_v62, %v3270_v60 }
  0x66   :  { %2291 = vmatpush1.msra.mxu1 %v2290_v8  ;;  %2380 = vmatprep.subr.mxu0 %v5059_v20  ;;  %v2773_v44 = vand.u32 4294901760, %v5155_v13  ;;  %v3266_v20 = vand.u32 4294901760, %v3265_v11 }
  0x67   :  { %2297 = vmatprep.subr.mxu1 %v2296_v30  ;;  %2383 = vmatpush1.msra.mxu0 %v5071_v5  ;;  %v3272_v5 = vand.u32 4294901760, %v3271_v17 }
  0x68   :  { %2416 = vmatprep.mubr.f32.mxu0 %v4483_v1  ;;  %2303 = vmatpush1.msra.mxu1 %v2302_v36  ;;  %v2774_v48 = vsub.f32 %v5155_v13, %v2773_v44 }
  0x69   :  { %2336 = vmatprep.mubr.f32.mxu1 %v4483_v1  ;;  %2419 = vmatmul.mubr.f32.vlgmr.msra.gmra.mxu0 %v5041_v35 }
  0x6a   :  { %2534 = vmatprep.subr.mxu0 %v2282_v24  ;;  %2338 = vmatmul.mubr.f32.vlgmr.msra.gmra.mxu1 %v5017_v4  ;;  %v2775_v52 = vand.u32 4294901760, %v2774_v48 }
  0x6b   :  { %4387 = vmatprep.subr.msk.mxu1 %vm80_vm9, %v4484_v16  ;;  %2538 = vmatpush1.msra.mxu0 %v2288_v19  ;;  %v4318_v19 = vsel %vm86_vm8, 1.0, %v4483_v1 }
  0x6c   :  { %4388 = vmatpush1.msk.msra.mxu1 %vm79_vm13, %v4484_v16  ;;  %2542 = vmatprep.subr.mxu0 %v2294_v6  ;;  %v4317_v6 = vsel %vm85_vm3, 1.0, %v4483_v1  ;;  %v3754_v28 = vsub.f32 %v4318_v19, %v4318_v19 }
  0x6d   :  { %4389 = vmatprep.subr.msk.mxu1 %vm72_vm0, %v4484_v16  ;;  %2546 = vmatpush1.msra.mxu0 %v2300_v29  ;;  %v3760_v31 = vsub.f32 %v4317_v6, %v4317_v6 }
  0x6e   :  { %2579 = vmatprep.mubr.f32.mxu0 %v4483_v1  ;;  %4390 = vmatpush1.msk.msra.mxu1 %vm71_vm10, %v4484_v16  ;;  %v3755_v37 = vand.u32 4294901760, %v3754_v28 }
  0x6f   :  { %2493 = vmatprep.mubr.f32.mxu1 %v4483_v1  ;;  %2581 = vmatmul.mubr.f32.vlgmr.msra.gmra.mxu0 %v5017_v4  ;;  %v3761_v8 = vand.u32 4294901760, %v3760_v31 }
  0x70   :  { %4395 = vmatprep.subr.msk.mxu0 %vm82_vm15, %v4484_v16  ;;  %2497 = vmatmul.mubr.f32.vlgmr.msra.gmra.mxu1 %v5063_v22  ;;  %v3756_v36 = vsub.f32 %v3754_v28, %v3755_v37 }
  0x71   :  { %4391 = vmatprep.subr.msk.mxu1 %vm80_vm9, %v4484_v16  ;;  %4396 = vmatpush1.msk.msra.mxu0 %vm81_vm1, %v4484_v16  ;;  %vm76_vm9 = vcmp.eq.s32.totalorder %v4523_v2, %v4811_v26  ;;  %v3762_v39 = vsub.f32 %v3760_v31, %v3761_v8 }
  0x72   :  { %4392 = vmatpush1.msk.msra.mxu1 %vm79_vm13, %v4484_v16  ;;  %4397 = vmatprep.subr.msk.mxu0 %vm74_vm11, %v4484_v16  ;;  %vm75_vm13 = vcmp.eq.s32.totalorder %v4523_v2, %v4848_v33  ;;  %v4308_v59 = vsel %vm76_vm9, 1.0, %v4483_v1  ;;  %v4136_v33 = vld [vmem:[%s5589_s3] sm:$0xf]  ;;  %s4487_s3 = smov [#allocation5]  }
  0x73   :  { %4393 = vmatprep.subr.msk.mxu1 %vm72_vm0, %v4484_v16  ;;  %4398 = vmatpush1.msk.msra.mxu0 %vm73_vm12, %v4484_v16  ;;  %v4307_v63 = vsel %vm75_vm13, 1.0, %v4483_v1  ;;  %v5266_v3 = vsub.f32 %v4308_v59, %v4308_v59  ;;  %v3763_v42 = vand.u32 4294901760, %v3762_v39  ;;  %s4294_s4 = sshll.u32 %s4487_s3, 4  ;;  %s4295_s4 = int_to_ptr.vmem [resolvable:$true] %s4294_s4 }
  0x74   :  { %2731 = vmatprep.mubr.f32.mxu0 %v4483_v1  ;;  %4394 = vmatpush1.msk.msra.mxu1 %vm71_vm10, %v4484_v16  ;;  %v5275_v9 = vsub.f32 %v4307_v63, %v4307_v63  ;;  %s4458_s28 = scalar_lea.vmem %s4295_s4, 128  ;;  %p4463_p6 = scmp.lt.s32.totalorder %s4295_s4, %s4295_s4 }
  0x75   :  { %2655 = vmatprep.mubr.f32.mxu1 %v4483_v1  ;;  %2737 = vmatmul.mubr.f32.vlgmr.msra.gmra.mxu0 %v5113_v34  ;;  %v3276_v10 = vand.u32 4294901760, %v5266_v3  ;;  %p4459_p5 = scmp.ne.s32.totalorder %s4295_s4, %s4458_s28  ;;  %p4464_p7 = scmp.lt.s32.totalorder %s4458_s28, %s4458_s28 }
  0x76   :  { %2865 = vmatprep.subr.mxu0 %v5155_v13  ;;  %2657 = vmatmul.mubr.f32.vlgmr.msra.gmra.mxu1 %v5017_v4  ;;  %v3282_v12 = vand.u32 4294901760, %v5275_v9 }
  0x77   :  { %2776 = vmatprep.subr.mxu1 %v2775_v52  ;;  %2868 = vmatpush1.msra.mxu0 %v5159_v41  ;;  %v3277_v18 = vsub.f32 %v5266_v3, %v3276_v10  ;;  %v3757_v41 = vand.u32 4294901760, %v3756_v36  ;;  %p4465_p8 = por %p4464_p7, %p4463_p6 }
  0x78   :  { %2782 = vmatpush1.msra.mxu1 %v2781_v54  ;;  %2871 = vmatprep.subr.mxu0 %v5166_v43  ;;  %v3283_v24 = vsub.f32 %v5275_v9, %v3282_v12 }
  0x79   :  { %2788 = vmatprep.subr.mxu1 %v2787_v55  ;;  %2874 = vmatpush1.msra.mxu0 %v5175_v45  ;;  %v3278_v21 = vand.u32 4294901760, %v3277_v18  ;;  %p4466_p9 = pnand %p4465_p8, %p4459_p5 }
  0x7a   :  { %2907 = vmatprep.mubr.f32.mxu0 %v4483_v1  ;;  %2794 = vmatpush1.msra.mxu1 %v2793_v0  ;;  %v3284_v23 = vand.u32 4294901760, %v3283_v24 }
  0x7b   :  { %2827 = vmatprep.mubr.f32.mxu1 %v4483_v1  ;;  %2910 = vmatmul.mubr.f32.vlgmr.msra.gmra.mxu0 %v5041_v35 }
  0x7c   :  { %3025 = vmatprep.subr.mxu0 %v2773_v44  ;;  %2829 = vmatmul.mubr.f32.vlgmr.msra.gmra.mxu1 %v5017_v4 }
  0x7d   :  { %4399 = vmatprep.subr.msk.mxu1 %vm82_vm15, %v4484_v16  ;;  %3029 = vmatpush1.msra.mxu0 %v2779_v46 }
  0x7e   :  { %4400 = vmatpush1.msk.msra.mxu1 %vm81_vm1, %v4484_v16  ;;  %3033 = vmatprep.subr.mxu0 %v2785_v47 }
  0x7f   :  { %4401 = vmatprep.subr.msk.mxu1 %vm74_vm11, %v4484_v16  ;;  %3037 = vmatpush1.msra.mxu0 %v2791_v49 }
  0x80   :  { %3070 = vmatprep.mubr.f32.mxu0 %v4483_v1  ;;  %4402 = vmatpush1.msk.msra.mxu1 %vm73_vm12, %v4484_v16 }
  0x81   :  { %2984 = vmatprep.mubr.f32.mxu1 %v4483_v1  ;;  %3072 = vmatmul.mubr.f32.vlgmr.msra.gmra.mxu0 %v5017_v4 }
  0x82   :  { %4407 = vmatprep.subr.msk.mxu0 %vm84_vm2, %v4484_v16  ;;  %2988 = vmatmul.mubr.f32.vlgmr.msra.gmra.mxu1 %v5063_v22 }
  0x83   :  { %4403 = vmatprep.subr.msk.mxu1 %vm82_vm15, %v4484_v16  ;;  %4408 = vmatpush1.msk.msra.mxu0 %vm5593_vm4, %v4484_v16  ;;  %vm78_vm15 = vcmp.eq.s32.totalorder %v4523_v2, %v4905_v40 }
  0x84   :  { %4404 = vmatpush1.msk.msra.mxu1 %vm81_vm1, %v4484_v16  ;;  %4409 = vmatprep.subr.msk.mxu0 %vm76_vm9, %v4484_v16  ;;  %vm77_vm1 = vcmp.eq.s32.totalorder %v4523_v2, %v4914_v15  ;;  %v4310_v27 = vsel %vm78_vm15, 1.0, %v4483_v1 }
  0x85   :  { %4405 = vmatprep.subr.msk.mxu1 %vm74_vm11, %v4484_v16  ;;  %4410 = vmatpush1.msk.msra.mxu0 %vm75_vm13, %v4484_v16  ;;  %v4309_v29 = vsel %vm77_vm1, 1.0, %v4483_v1  ;;  %v3766_v32 = vsub.f32 %v4310_v27, %v4310_v27 }
  0x86   :  { %3222 = vmatprep.mubr.f32.mxu0 %v4483_v1  ;;  %4406 = vmatpush1.msk.msra.mxu1 %vm73_vm12, %v4484_v16  ;;  %v3772_v25 = vsub.f32 %v4309_v29, %v4309_v29 }
  0x87   :  { %3146 = vmatprep.mubr.f32.mxu1 %v4483_v1  ;;  %3228 = vmatmul.mubr.f32.vlgmr.msra.gmra.mxu0 %v5113_v34  ;;  %v3767_v30 = vand.u32 4294901760, %v3766_v32 }
  0x88   :  { %3356 = vmatprep.subr.mxu0 %v5255_v61  ;;  %3148 = vmatmul.mubr.f32.vlgmr.msra.gmra.mxu1 %v5017_v4  ;;  %v3773_v38 = vand.u32 4294901760, %v3772_v25 }
  0x89   :  { %3267 = vmatprep.subr.mxu1 %v3266_v20  ;;  %3359 = vmatpush1.msra.mxu0 %v5259_v62  ;;  %v3768_v14 = vsub.f32 %v3766_v32, %v3767_v30 }
  0x8a   :  { %3273 = vmatpush1.msra.mxu1 %v3272_v5  ;;  %3362 = vmatprep.subr.mxu0 %v5266_v3  ;;  %v3774_v13 = vsub.f32 %v3772_v25, %v3773_v38 }
  0x8b   :  { %3279 = vmatprep.subr.mxu1 %v3278_v21  ;;  %3365 = vmatpush1.msra.mxu0 %v5275_v9  ;;  %v3769_v43 = vand.u32 4294901760, %v3768_v14 }
  0x8c   :  { %3398 = vmatprep.mubr.f32.mxu0 %v4483_v1  ;;  %3285 = vmatpush1.msra.mxu1 %v3284_v23  ;;  %v3775_v26 = vand.u32 4294901760, %v3774_v13 }
  0x8d   :  { %3318 = vmatprep.mubr.f32.mxu1 %v4483_v1  ;;  %3401 = vmatmul.mubr.f32.vlgmr.msra.gmra.mxu0 %v5041_v35 }
  0x8e   :  { %3516 = vmatprep.subr.mxu0 %v3264_v58  ;;  %3320 = vmatmul.mubr.f32.vlgmr.msra.gmra.mxu1 %v5017_v4 }
  0x8f   :  { %4411 = vmatprep.subr.msk.mxu1 %vm84_vm2, %v4484_v16  ;;  %3520 = vmatpush1.msra.mxu0 %v3270_v60 }
  0x90   :  { %4412 = vmatpush1.msk.msra.mxu1 %vm5594_vm5, %v4484_v16  ;;  %3524 = vmatprep.subr.mxu0 %v3276_v10 }
  0x91   :  { %4413 = vmatprep.subr.msk.mxu1 %vm76_vm9, %v4484_v16  ;;  %3528 = vmatpush1.msra.mxu0 %v3282_v12 }
  0x92   :  { %3561 = vmatprep.mubr.f32.mxu0 %v4483_v1  ;;  %4414 = vmatpush1.msk.msra.mxu1 %vm75_vm13, %v4484_v16 }
  0x93   :  { %3475 = vmatprep.mubr.f32.mxu1 %v4483_v1  ;;  %3563 = vmatmul.mubr.f32.vlgmr.msra.gmra.mxu0 %v5017_v4 }
  0x94   :  { %4419 = vmatprep.subr.msk.mxu0 %vm86_vm8, %v4484_v16  ;;  %3479 = vmatmul.mubr.f32.vlgmr.msra.gmra.mxu1 %v5063_v22 }
  0x95   :  { %4415 = vmatprep.subr.msk.mxu1 %vm84_vm2, %v4484_v16  ;;  %4420 = vmatpush1.msk.msra.mxu0 %vm85_vm3, %v4484_v16  ;;  %vm4172_vm2 = vcmask 1043456  }
  0x96   :  { %4416 = vmatpush1.msk.msra.mxu1 %vm5595_vm6, %v4484_v16  ;;  %4421 = vmatprep.subr.msk.mxu0 %vm78_vm15, %v4484_v16 }
  0x97   :  { %4417 = vmatprep.subr.msk.mxu1 %vm76_vm9, %v4484_v16  ;;  %4422 = vmatpush1.msk.msra.mxu0 %vm77_vm1, %v4484_v16 }
  0x98   :  { %3713 = vmatprep.mubr.f32.mxu0 %v4483_v1  ;;  %4418 = vmatpush1.msk.msra.mxu1 %vm75_vm13, %v4484_v16 }
  0x99   :  { %3637 = vmatprep.mubr.f32.mxu1 %v4483_v1  ;;  %3719 = vmatmul.mubr.f32.vlgmr.msra.gmra.mxu0 %v5113_v34 }
  0x9a   :  { %3639 = vmatmul.mubr.f32.vlgmr.msra.gmra.mxu1 %v5017_v4  ;;  %3758 = vmatprep.subr.mxu1 %v3757_v41 }
  0x9b   :  { %3847 = vmatprep.subr.mxu0 %v3754_v28  ;;  %3764 = vmatpush1.msra.mxu1 %v3763_v42 }
  0x9c   :  { %3850 = vmatpush1.msra.mxu0 %v3760_v31  ;;  %3770 = vmatprep.subr.mxu1 %v3769_v43 }
  0x9d   :  { %3809 = vmatprep.mubr.f32.mxu1 %v4483_v1  ;;  %3776 = vmatpush1.msra.mxu1 %v3775_v26 }
  0x9e   :  { %3853 = vmatprep.subr.mxu0 %v3766_v32  ;;  %3811 = vmatmul.mubr.f32.vlgmr.msra.gmra.mxu1 %v5017_v4 }
  0x9f   :  { %3856 = vmatpush1.msra.mxu0 %v3772_v25  ;;  %3889 = vmatprep.mubr.f32.mxu0 %v4483_v1 }
  0xa0   :  { %4423 = vmatprep.subr.msk.mxu1 %vm86_vm8, %v4484_v16  ;;  %3892 = vmatmul.mubr.f32.vlgmr.msra.gmra.mxu0 %v5041_v35  ;;  %v4485_v35 = vmov 0  }
  0xa1   :  { %4424 = vmatpush1.msk.msra.mxu1 %vm85_vm3, %v4484_v16  ;;  %4007 = vmatprep.subr.mxu0 %v3755_v37 }
  0xa2   :  { %4425 = vmatprep.subr.msk.mxu1 %vm78_vm15, %v4484_v16  ;;  %4011 = vmatpush1.msra.mxu0 %v3761_v8 }
  0xa3   :  { %4426 = vmatpush1.msk.msra.mxu1 %vm77_vm1, %v4484_v16  ;;  %3966 = vmatprep.mubr.f32.mxu1 %v4483_v1 }
  0xa4   :  { %4015 = vmatprep.subr.mxu0 %v3767_v30  ;;  %3970 = vmatmul.mubr.f32.vlgmr.msra.gmra.mxu1 %v5063_v22 }
  0xa5   :  { %4019 = vmatpush1.msra.mxu0 %v3773_v38  ;;  %4052 = vmatprep.mubr.f32.mxu0 %v4483_v1 }
  0xa6   :  { %4427 = vmatprep.subr.msk.mxu1 %vm86_vm8, %v4484_v16  ;;  %4054 = vmatmul.mubr.f32.vlgmr.msra.gmra.mxu0 %v5017_v4 }
  0xa7   :  { %4428 = vmatpush1.msk.msra.mxu1 %vm85_vm3, %v4484_v16  ;;  %4128 = vmatprep.mubr.f32.mxu1 %v4483_v1 }
  0xa8   :  { %4429 = vmatprep.subr.msk.mxu1 %vm78_vm15, %v4484_v16  ;;  %4437 = vset.pattern.permute.xlu0 %v4485_v35 }
  0xa9   :  { %4430 = vmatpush1.msk.msra.mxu1 %vm77_vm1, %v4484_v16  ;;  %4139 = vperm.xlu0 %4437, %v4136_v33  }
  0xaa   :  { %4130 = vmatmul.mubr.f32.vlgmr.msra.gmra.mxu1 %v5017_v4 }
  0xad   :  { %4161 = vperm.xlu0 %4437, %v4158_v7  }
  0xdc   :  { %v280_v22 = vpop.f32.mrf.mxu0 }
  0xde   :  { %v282_v40 = vpop.f32.mrf.mxu0 }
  0xe0   :  { %v453_v34 = vpop.f32.mrf.mxu0 }
  0xe2   :  { %v455_v45 = vpop.f32.mrf.mxu0 }
  0xe3   :  { %v372_v44 = vpop.f32.mrf.mxu1 }
  0xe4   :  { %v373_v1 = vadd.f32 %v372_v44, %v280_v22 }
  0xe5   :  { %v374_v46 = vpop.f32.mrf.mxu1 }
  0xe6   :  { %v375_v47 = vadd.f32 %v374_v46, %v282_v40  ;;  %v454_v15 = vadd.f32 %v453_v34, %v373_v1 }
  0xe7   :  { %v615_v16 = vpop.f32.mrf.mxu0 }
  0xe8   :  { %v456_v48 = vadd.f32 %v455_v45, %v375_v47  ;;  %v531_v49 = vpop.f32.mrf.mxu1 }
  0xe9   :  { %v532_v50 = vadd.f32 %v531_v49, %v454_v15  ;;  %v617_v4 = vpop.f32.mrf.mxu0 }
  0xea   :  { %v533_v51 = vpop.f32.mrf.mxu1 }
  0xeb   :  { %v534_v52 = vadd.f32 %v533_v51, %v456_v48  ;;  %v616_v53 = vadd.f32 %v615_v16, %v532_v50 }
  0xed   :  { %v771_v54 = vpop.f32.mrf.mxu0  ;;  %v618_v55 = vadd.f32 %v617_v4, %v534_v52 }
  0xee   :  { %v691_v56 = vpop.f32.mrf.mxu1 }
  0xef   :  { %v692_v0 = vadd.f32 %v691_v56, %v616_v53  ;;  %v773_v57 = vpop.f32.mrf.mxu0 }
  0xf0   :  { %v693_v59 = vpop.f32.mrf.mxu1 }
  0xf1   :  { %v694_v61 = vadd.f32 %v693_v59, %v618_v55 }
  0xf3   :  { %v944_v62 = vpop.f32.mrf.mxu0 }
  0xf4   :  { %v863_v63 = vpop.f32.mrf.mxu1 }
  0xf5   :  { %v946_v3 = vpop.f32.mrf.mxu0  ;;  %v864_v33 = vadd.f32 %v863_v63, %v771_v54 }
  0xf6   :  { %v865_v58 = vpop.f32.mrf.mxu1 }
  0xf7   :  { %v866_v40 = vadd.f32 %v865_v58, %v773_v57  ;;  %v945_v46 = vadd.f32 %v944_v62, %v864_v33 }
  0xf9   :  { %v1106_v9 = vpop.f32.mrf.mxu0  ;;  %v947_v16 = vadd.f32 %v946_v3, %v866_v40 }
  0xfa   :  { %v1022_v60 = vpop.f32.mrf.mxu1 }
  0xfb   :  { %v1108_v10 = vpop.f32.mrf.mxu0  ;;  %v1023_v4 = vadd.f32 %v1022_v60, %v945_v46 }
  0xfc   :  { %v1024_v11 = vpop.f32.mrf.mxu1 }
  0xfd   :  { %v1025_v54 = vadd.f32 %v1024_v11, %v947_v16  ;;  %v1107_v57 = vadd.f32 %v1106_v9, %v1023_v4 }
  0xff   :  { %v5468_v12 = vpop.f32.mrf.mxu0  ;;  %v1109_v62 = vadd.f32 %v1108_v10, %v1025_v54 }
 0x100   :  { %v1182_v17 = vpop.f32.mrf.mxu1 }
 0x101   :  { %v5470_v18 = vpop.f32.mrf.mxu0 }
 0x102   :  { %v1184_v20 = vpop.f32.mrf.mxu1 }
 0x103   :  { %v1185_v11 = vadd.f32 %v1184_v20, %v1109_v62 }
 0x105   :  { %v5472_v24 = vpop.f32.mrf.mxu0 }
 0x106   :  { %v1354_v5 = vpop.f32.mrf.mxu1 }
 0x107   :  { %v5474_v21 = vpop.f32.mrf.mxu0 }
 0x108   :  { %v5476_v19 = vpop.f32.mrf.mxu1 }
 0x109   :  { %v1357_v10 = vadd.f32 %v5476_v19, %v5470_v18 }
 0x10b   :  { %v5478_v23 = vpop.f32.mrf.mxu0  ;;  %v1438_v18 = vadd.f32 %v5474_v21, %v1357_v10 }
 0x10c   :  { %v5480_v6 = vpop.f32.mrf.mxu1 }
 0x10d   :  { %v5482_v27 = vpop.f32.mrf.mxu0 }
 0x10e   :  { %v5484_v28 = vpop.f32.mrf.mxu1 }
 0x111   :  { %v5486_v29 = vpop.f32.mrf.mxu0 }
 0x112   :  { %v5488_v31 = vpop.f32.mrf.mxu1 }
 0x113   :  { %v5490_v32 = vpop.f32.mrf.mxu0 }
 0x114   :  { %v5492_v25 = vpop.f32.mrf.mxu1 }
 0x117   :  { %v5494_v37 = vpop.f32.mrf.mxu0 }
 0x118   :  { %v5496_v8 = vpop.f32.mrf.mxu1 }
 0x119   :  { %v5498_v30 = vpop.f32.mrf.mxu0 }
 0x11a   :  { %v5500_v38 = vpop.f32.mrf.mxu1 }
 0x11d   :  { %v5502_v36 = vpop.f32.mrf.mxu0 }
 0x11e   :  { %v5504_v39 = vpop.f32.mrf.mxu1 }
 0x11f   :  { %v5506_v14 = vpop.f32.mrf.mxu0 }
 0x120   :  { %v5508_v13 = vpop.f32.mrf.mxu1 }
 0x123   :  { %v2247_v41 = vpop.f32.mrf.mxu0 }
 0x124   :  { %v5510_v42 = vpop.f32.mrf.mxu1  ;;  %v2248_v35 = vadd.f32 %v2247_v41, %v692_v0  ;;  %v5514_v0 = vpop.permute.xlu0 %4139 }
 0x125   :  { %v2249_v43 = vpop.f32.mrf.mxu0 }
 0x126   :  { %v5512_v26 = vpop.f32.mrf.mxu1  ;;  %v2250_v34 = vadd.f32 %v2249_v43, %v694_v61  ;;  %v1183_v43 = vadd.f32 %v1182_v17, %v1107_v57 }
 0x129   :  { %v2420_v7 = vpop.f32.mrf.mxu0 }
 0x12a   :  { %v2339_v22 = vpop.f32.mrf.mxu1 }
 0x12b   :  { %v2340_v44 = vadd.f32 %v2339_v22, %v2248_v35  ;;  %v2422_v1 = vpop.f32.mrf.mxu0  ;;  %v1355_v35 = vadd.f32 %v1354_v5, %v5468_v12 }
 0x12c   :  { %v2341_v45 = vpop.f32.mrf.mxu1 }
 0x12d   :  { %v2342_v47 = vadd.f32 %v2341_v45, %v2250_v34  ;;  %v2421_v15 = vadd.f32 %v2420_v7, %v2340_v44  ;;  %v5518_v7 = vpop.permute.xlu0 %4161  ;;  %v1436_v12 = vadd.f32 %v5472_v24, %v1355_v35 }
 0x12f   :  { %v2582_v48 = vpop.f32.mrf.mxu0  ;;  %v2423_v49 = vadd.f32 %v2422_v1, %v2342_v47  ;;  %v1514_v54 = vadd.f32 %v5480_v6, %v1436_v12 }
 0x130   :  { %v2498_v50 = vpop.f32.mrf.mxu1 }
 0x131   :  { %v2499_v51 = vadd.f32 %v2498_v50, %v2421_v15  ;;  %v2584_v52 = vpop.f32.mrf.mxu0 }
 0x132   :  { %v2500_v53 = vpop.f32.mrf.mxu1 }
 0x133   :  { %v2501_v55 = vadd.f32 %v2500_v53, %v2423_v49  ;;  %v2583_v56 = vadd.f32 %v2582_v48, %v2499_v51 }
 0x135   :  { %v2738_v59 = vpop.f32.mrf.mxu0  ;;  %v2585_v61 = vadd.f32 %v2584_v52, %v2501_v55 }
 0x136   :  { %v2658_v63 = vpop.f32.mrf.mxu1  ;;  %v2739_v22 = vadd.f32 %v2738_v59, %v1183_v43 }
 0x137   :  { %v2659_v58 = vadd.f32 %v2658_v63, %v2583_v56  ;;  %v2740_v41 = vpop.f32.mrf.mxu0 }
 0x138   :  { %v2660_v3 = vpop.f32.mrf.mxu1  ;;  %v2741_v1 = vadd.f32 %v2740_v41, %v1185_v11  ;;  %v1598_v41 = vadd.f32 %v5478_v23, %v1514_v54  ;;  %v1848_v23 = vadd.f32 %v5500_v38, %v5490_v32 }
 0x139   :  { %v2661_v33 = vadd.f32 %v2660_v3, %v2585_v61  ;;  %v4142_v60 = vadd.f32 %v5514_v0, %v2659_v58  ;;  %v1516_v61 = vadd.f32 %v5484_v28, %v1438_v18 }
 0x13b   :  { %v4143_v40 = vadd.f32 %v5514_v0, %v2661_v33  ;;  %v2911_v9 = vpop.f32.mrf.mxu0  ;;  %v4150_v34 = vmax.f32 %v4142_v60, 0.0  ;;  %v1600_v6 = vadd.f32 %v5482_v27, %v1516_v61 }
 0x13c   :  { %v2830_v44 = vpop.f32.mrf.mxu1 }
 0x13d   :  { %v4151_v17 = vmax.f32 %v4143_v40, 0.0  ;;  %v2831_v45 = vadd.f32 %v2830_v44, %v2739_v22  ;;  %v2913_v46 = vpop.f32.mrf.mxu0  ;;  %v4164_v47 = vmul.f32 %v5518_v7, %v4150_v34  ;;  %v1846_v40 = vadd.f32 %v5496_v8, %v5486_v29 }
 0x13e   :  { %v2832_v5 = vpop.f32.mrf.mxu1  ;;  %v1674_v34 = vadd.f32 %v5488_v31, %v1598_v41  ;;  %v1676_v27 = vadd.f32 %v5492_v25, %v1600_v6 }
 0x13f   :  { %v4165_v20 = vmul.f32 %v5518_v7, %v4151_v17  ;;  %v4173_v15 = vsel %vm4172_vm2, %v4164_v47, 0.0  ;;  %v2833_v16 = vadd.f32 %v2832_v5, %v2741_v1  ;;  %v2912_v48 = vadd.f32 %v2911_v9, %v2831_v45 }
 0x140   :  { %v4174_v49 = vrot.slane %v4173_v15, 4  ;;  %v1927_v47 = vadd.f32 %v5494_v37, %v1846_v40 }
 0x141   :  { %v4180_v19 = vsel %vm4172_vm2, %v4165_v20, 0.0  ;;  %v3073_v50 = vpop.f32.mrf.mxu0  ;;  %v2914_v4 = vadd.f32 %v2913_v46, %v2833_v16  ;;  %v1929_v16 = vadd.f32 %v5498_v30, %v1848_v23 }
 0x142   :  { %v4181_v51 = vrot.slane %v4180_v19, 4  ;;  %v2989_v52 = vpop.f32.mrf.mxu1  ;;  %v4175_v53 = vadd.f32 %v4174_v49, %v4173_v15 }
 0x143   :  { %v2990_v24 = vadd.f32 %v2989_v52, %v2912_v48  ;;  %v3075_v55 = vpop.f32.mrf.mxu0 }
 0x144   :  { %v2991_v56 = vpop.f32.mrf.mxu1  ;;  %v4176_v57 = vrot.slane %v4175_v53, 2  ;;  %v4182_v59 = vadd.f32 %v4181_v51, %v4180_v19 }
 0x145   :  { %v2992_v63 = vadd.f32 %v2991_v56, %v2914_v4  ;;  %v3074_v62 = vadd.f32 %v3073_v50, %v2990_v24  ;;  %v2005_v50 = vadd.f32 %v5504_v39, %v1927_v47 }
 0x146   :  { %v4177_v58 = vadd.f32 %v4176_v57, %v4175_v53  ;;  %v4183_v21 = vrot.slane %v4182_v59, 2 }
 0x147   :  { %v3229_v3 = vpop.f32.mrf.mxu0  ;;  %v3076_v43 = vadd.f32 %v3075_v55, %v2992_v63  ;;  %v2007_v55 = vadd.f32 %v5508_v13, %v1929_v16  ;;  %v4486_v63 = vmov 1966171168  }
 0x148   :  { %v3149_v33 = vpop.f32.mrf.mxu1  ;;  %v4178_v60 = vrot.slane %v4177_v58, 1  ;;  %v4184_v35 = vadd.f32 %v4183_v21, %v4182_v59  ;;  %v3230_v45 = vadd.f32 %v3229_v3, %v1674_v34 }
 0x149   :  { %v3150_v11 = vadd.f32 %v3149_v33, %v3074_v62  ;;  %v3231_v22 = vpop.f32.mrf.mxu0  ;;  %v4242_v62 = vunpack.c.l.s4 %v4486_v63 }
 0x14a   :  { %v3151_v9 = vpop.f32.mrf.mxu1  ;;  %v4185_v28 = vrot.slane %v4184_v35, 1  ;;  %v5539_v1 = vadd.f32 %v4178_v60, %v4177_v58  ;;  %v3232_v32 = vadd.f32 %v3231_v22, %v1676_v27  ;;  %v2089_v58 = vadd.f32 %v5502_v36, %v2005_v50 }
 0x14b   :  { %v4144_v10 = vadd.f32 %v5514_v0, %v3150_v11  ;;  %v3152_v44 = vadd.f32 %v3151_v9, %v3076_v43  ;;  %v2091_v43 = vadd.f32 %v5506_v14, %v2007_v55  ;;  %v4243_v22 = vunpack.c.0.s8 %v4242_v62 }
 0x14c   :  { %v5541_v17 = vadd.f32 %v4185_v28, %v4184_v35  ;;  %v2165_v40 = vadd.f32 %v5510_v42, %v2089_v58 }
 0x14d   :  { %v4152_v46 = vmax.f32 %v4144_v10, 0.0  ;;  %v4145_v29 = vadd.f32 %v5514_v0, %v3152_v44  ;;  %v3402_v8 = vpop.f32.mrf.mxu0  ;;  %v2167_v10 = vadd.f32 %v5512_v26, %v2091_v43 }
 0x14e   :  { %v3321_v31 = vpop.f32.mrf.mxu1  ;;  %v4237_v12 = vcombine.low %v5539_v1, %v5541_v17 }
 0x14f   :  { %v4166_v5 = vmul.f32 %v5518_v7, %v4152_v46  ;;  %v4153_v38 = vmax.f32 %v4145_v29, 0.0  ;;  %v3322_v20 = vadd.f32 %v3321_v31, %v3230_v45  ;;  %v3404_v15 = vpop.f32.mrf.mxu0  ;;  %v5561_v29 = vsub.s32 %v4243_v22, %v4523_v2 }
 0x150   :  { %v3323_v25 = vpop.f32.mrf.mxu1 }
 0x151   :  { %v4187_v48 = vsel %vm4172_vm2, %v4166_v5, 0.0  ;;  %v4167_v49 = vmul.f32 %v5518_v7, %v4153_v38  ;;  %v3324_v18 = vadd.f32 %v3323_v25, %v3232_v32  ;;  %v3403_v19 = vadd.f32 %v3402_v8, %v3322_v20 }
 0x152   :  { %v4188_v37 = vrot.slane %v4187_v48, 4  ;;  %v4247_v25 = vrot.slane %v4237_v12, %v5561_v29 }
 0x153   :  { %v4194_v4 = vsel %vm4172_vm2, %v4167_v49, 0.0  ;;  %v3564_v51 = vpop.f32.mrf.mxu0  ;;  %v3405_v52 = vadd.f32 %v3404_v15, %v3324_v18 }
 0x154   :  { %v4189_v53 = vadd.f32 %v4188_v37, %v4187_v48  ;;  %v4195_v54 = vrot.slane %v4194_v4, 4  ;;  %v3480_v24 = vpop.f32.mrf.mxu1 }
 0x155   :  { %v3481_v30 = vadd.f32 %v3480_v24, %v3403_v19  ;;  %v3566_v56 = vpop.f32.mrf.mxu0 }
 0x156   :  { %v4190_v57 = vrot.slane %v4189_v53, 2  ;;  %v4196_v59 = vadd.f32 %v4195_v54, %v4194_v4  ;;  %v3482_v61 = vpop.f32.mrf.mxu1 }
 0x157   :  { %v3483_v21 = vadd.f32 %v3482_v61, %v3405_v52  ;;  %v3565_v39 = vadd.f32 %v3564_v51, %v3481_v30 }
 0x158   :  { %v4191_v41 = vadd.f32 %v4190_v57, %v4189_v53  ;;  %v4197_v3 = vrot.slane %v4196_v59, 2 }
 0x159   :  { %v3720_v33 = vpop.f32.mrf.mxu0  ;;  %v3567_v35 = vadd.f32 %v3566_v56, %v3483_v21 }
 0x15a   :  { %v3640_v60 = vpop.f32.mrf.mxu1  ;;  %v4192_v6 = vrot.slane %v4191_v41, 1  ;;  %v4198_v13 = vadd.f32 %v4197_v3, %v4196_v59  ;;  %v3721_v44 = vadd.f32 %v3720_v33, %v2165_v40 }
 0x15b   :  { %v3641_v11 = vadd.f32 %v3640_v60, %v3565_v39  ;;  %v3722_v36 = vpop.f32.mrf.mxu0 }
 0x15c   :  { %v3642_v9 = vpop.f32.mrf.mxu1  ;;  %v4199_v28 = vrot.slane %v4198_v13, 1  ;;  %v4193_v27 = vadd.f32 %v4192_v6, %v4191_v41  ;;  %v3723_v8 = vadd.f32 %v3722_v36, %v2167_v10 }
 0x15d   :  { %v4146_v34 = vadd.f32 %v5514_v0, %v3641_v11  ;;  %v3643_v23 = vadd.f32 %v3642_v9, %v3567_v35 }
 0x15e   :  { %v4200_v14 = vadd.f32 %v4199_v28, %v4198_v13  ;;  %v3812_v46 = vpop.f32.mrf.mxu1 }
 0x15f   :  { %v4154_v45 = vmax.f32 %v4146_v34, 0.0  ;;  %v4147_v47 = vadd.f32 %v5514_v0, %v3643_v23  ;;  %v3813_v42 = vadd.f32 %v3812_v46, %v3721_v44 }
 0x160   :  { %v3893_v31 = vpop.f32.mrf.mxu0  ;;  %v3814_v5 = vpop.f32.mrf.mxu1  ;;  %v4238_v32 = vcombine.low %v4193_v27, %v4200_v14 }
 0x161   :  { %v4155_v38 = vmax.f32 %v4147_v47, 0.0  ;;  %v3894_v20 = vadd.f32 %v3893_v31, %v3813_v42  ;;  %v3815_v15 = vadd.f32 %v3814_v5, %v3723_v8  ;;  %v4168_v26 = vmul.f32 %v5518_v7, %v4154_v45 }
 0x162   :  { %v3895_v16 = vpop.f32.mrf.mxu0  ;;  %v4254_v2 = vrot.slane %v4238_v32, %v5561_v29 }
 0x163   :  { %v4169_v48 = vmul.f32 %v5518_v7, %v4155_v38  ;;  %v3896_v49 = vadd.f32 %v3895_v16, %v3815_v15  ;;  %v4201_v4 = vsel %vm4172_vm2, %v4168_v26, 0.0 }
 0x164   :  { %v3971_v18 = vpop.f32.mrf.mxu1  ;;  %v4269_v19 = vcombine.low %v4247_v25, %v4254_v2  ;;  %v4202_v1 = vrot.slane %v4201_v4, 4 }
 0x165   :  { %v4208_v37 = vsel %vm4172_vm2, %v4169_v48, 0.0  ;;  %v3972_v50 = vadd.f32 %v3971_v18, %v3894_v20 }
 0x166   :  { %v4055_v51 = vpop.f32.mrf.mxu0  ;;  %v3973_v52 = vpop.f32.mrf.mxu1  ;;  %v4209_v53 = vrot.slane %v4208_v37, 4  ;;  %v4203_v63 = vadd.f32 %v4202_v1, %v4201_v4  ;;  %v4277_v5 = vrot.slane %v4269_v19, %v5561_v29 }
 0x167   :  { %v4056_v54 = vadd.f32 %v4055_v51, %v3972_v50  ;;  %v3974_v24 = vadd.f32 %v3973_v52, %v3896_v49 }
 0x168   :  { %v4057_v55 = vpop.f32.mrf.mxu0  ;;  %v4210_v56 = vadd.f32 %v4209_v53, %v4208_v37  ;;  %v4204_v3 = vrot.slane %v4203_v63, 2 }
 0x169   :  { %v4058_v17 = vadd.f32 %v4057_v55, %v3974_v24 }
 0x16a   :  { %v4131_v12 = vpop.f32.mrf.mxu1  ;;  %v4211_v21 = vrot.slane %v4210_v56, 2  ;;  %v4205_v13 = vadd.f32 %v4204_v3, %v4203_v63 }
 0x16b   :  { %v4132_v30 = vadd.f32 %v4131_v12, %v4056_v54 }
 0x16c   :  { %v4133_v57 = vpop.f32.mrf.mxu1  ;;  %v4212_v60 = vadd.f32 %v4211_v21, %v4210_v56 }
 0x16d   :  { %v4148_v59 = vadd.f32 %v5514_v0, %v4132_v30  ;;  %v4134_v61 = vadd.f32 %v4133_v57, %v4058_v17 }
 0x16e   :  { %v4213_v40 = vrot.slane %v4212_v60, 1 }
 0x16f   :  { %v4156_v62 = vmax.f32 %v4148_v59, 0.0  ;;  %v4149_v58 = vadd.f32 %v5514_v0, %v4134_v61  ;;  %v4206_v0 = vrot.slane %v4205_v13, 1 }
 0x170   :  { %v4214_v10 = vadd.f32 %v4213_v40, %v4212_v60 }
 0x171   :  { %v4170_v39 = vmul.f32 %v5518_v7, %v4156_v62  ;;  %v4157_v41 = vmax.f32 %v4149_v58, 0.0  ;;  %v4207_v27 = vadd.f32 %v4206_v0, %v4205_v13 }
 0x173   :  { %v4215_v43 = vsel %vm4172_vm2, %v4170_v39, 0.0  ;;  %v4171_v33 = vmul.f32 %v5518_v7, %v4157_v41  ;;  %v4239_v46 = vcombine.low %v4207_v27, %v4214_v10 }
 0x174   :  { %v4216_v35 = vrot.slane %v4215_v43, 4 }
 0x175   :  { %v4222_v6 = vsel %vm4172_vm2, %v4171_v33, 0.0  ;;  %v4261_v47 = vrot.slane %v4239_v46, %v5561_v29 }
 0x176   :  { %v4217_v11 = vadd.f32 %v4216_v35, %v4215_v43  ;;  %v4223_v22 = vrot.slane %v4222_v6, 4 }
 0x178   :  { %v4218_v9 = vrot.slane %v4217_v11, 2  ;;  %v4224_v28 = vadd.f32 %v4223_v22, %v4222_v6 }
 0x17a   :  { %v4219_v34 = vadd.f32 %v4218_v9, %v4217_v11  ;;  %v4225_v36 = vrot.slane %v4224_v28, 2 }
 0x17c   :  { %v4220_v44 = vrot.slane %v4219_v34, 1  ;;  %v4226_v23 = vadd.f32 %v4225_v36, %v4224_v28 }
 0x17e   :  { %v4227_v14 = vrot.slane %v4226_v23, 1  ;;  %v4221_v45 = vadd.f32 %v4220_v44, %v4219_v34 }
 0x180   :  { %v4228_v7 = vadd.f32 %v4227_v14, %v4226_v23 }
 0x182   :  { %v4240_v8 = vcombine.low %v4221_v45, %v4228_v7 }
 0x184   :  { %v4268_v42 = vrot.slane %v4240_v8, %v5561_v29 }
 0x186   :  { %v4270_v31 = vcombine.low %v4261_v47, %v4268_v42 }
 0x188   :  { %v4284_v32 = vrot.slane %v4270_v31, %v5561_v29 }
 0x18a   :  { %v4285_v38 = vcombine.low %v4277_v5, %v4284_v32 }
 0x18c   :  { %4287 = vst [vmem:[#allocation5] sm:$0xff] %v4285_v38 }
 0x18d   :  { %4469 = shalt.err (!%p4466_p9)
}
 0x18e   :  { %4297 = dma.vmem_to_hbm [thread:$0]  %s4295_s4, 128, %s5591_s5, [#allocation4]  }
 0x18f   :  { %4480 = dma.done.wait [#allocation4], 128  }
 0x190   :  { %4481 = vsyncadd [#allocation4], 4294967168 }
 0x191   :  { %4301 = vsyncpa [#allocation3], 1 }
 0x192   :  { %4302 = vsyncpa [#allocation4], 1 }

</bundles_post_ra>
